<compile_context>
chip_gen: v7x
topology: tpu7x:2x2x1
jax: 0.10.0
libtpu: 0.0.40
codegen_flags: <defaults>
</compile_context>

<pallas_src>
import functools

import numpy as np
import jax
import jax.numpy as jnp
from jax import lax
from jax.experimental import pallas as pl
from jax.experimental.pallas import tpu as pltpu


def _gaussian_1d(w_size: int, sigma: float) -> np.ndarray:
    """Matches g_function from the PyTorch module (computed in f64)."""
    g = np.array(
        [np.exp(-((x - w_size // 2) ** 2) / float(2 * sigma ** 2)) for x in range(w_size)],
        dtype=np.float64,
    )
    return g / g.sum()


def _band_conv_matrix(n: int, g: np.ndarray) -> np.ndarray:
    """Banded (n x n) matrix M with M[i, r] = g[r - i + p].

    Left-multiplying (M @ X) applies the 1-D "same" cross-correlation with
    zero padding along the row axis of X — the padding is folded into the band.
    """
    k = len(g)
    p = k // 2
    m = np.zeros((n, n), dtype=np.float32)
    for i in range(n):
        for r in range(max(0, i - p), min(n, i + p + 1)):
            m[i, r] = np.float32(g[r - i + p])
    return m


def _ssim_kernel(x1_ref, x2_ref, av_ref, bhb_ref, out_ref, *,
                 h: int, inv_hw: float, fused: bool):
    """One grid step: P image planes packed along lanes as an (H, P*W) slab.

    x1_ref, x2_ref: (1, H, P*W) f32 slabs in VMEM.
    av_ref:         (5H, 5H) kron(I5, Av) if fused else (H, H) Av.
    bhb_ref:        (P*W, P*W)  block-diag banded horizontal conv matrix.
    out_ref:        (1, 1, P*W) per-lane partial means (sum over H) / (H*W).
    """
    x1 = x1_ref[0]          # (H, P*W)
    x2 = x2_ref[0]
    av = av_ref[...]
    bhb = bhb_ref[...]      # (P*W, P*W)

    if fused:
        # Stack the five quantities along the sublane axis and convolve all of
        # them with two MXU matmuls total (block-diag vertical factor).
        x5 = jnp.concatenate([x1, x2, x1 * x1, x2 * x2, x1 * x2], axis=0)  # (5H, PW)
        y = jnp.dot(av, x5, preferred_element_type=jnp.float32)           # vertical
        z = jnp.dot(y, bhb, preferred_element_type=jnp.float32)           # horizontal
        mu1 = z[0 * h:1 * h]
        mu2 = z[1 * h:2 * h]
        e11 = z[2 * h:3 * h]
        e22 = z[3 * h:4 * h]
        e12 = z[4 * h:5 * h]
    else:
        def conv(x):
            y = jnp.dot(av, x, preferred_element_type=jnp.float32)
            return jnp.dot(y, bhb, preferred_element_type=jnp.float32)

        mu1 = conv(x1)
        mu2 = conv(x2)
        e11 = conv(x1 * x1)
        e22 = conv(x2 * x2)
        e12 = conv(x1 * x2)

    mu1_sq = mu1 * mu1
    mu2_sq = mu2 * mu2
    mu1_mu2 = mu1 * mu2
    sigma1_sq = e11 - mu1_sq
    sigma2_sq = e22 - mu2_sq
    sigma12 = e12 - mu1_mu2

    C1 = 0.01 ** 2
    C2 = 0.03 ** 2
    ssim_map = ((2.0 * mu1_mu2 + C1) * (2.0 * sigma12 + C2)) / (
        (mu1_sq + mu2_sq + C1) * (sigma1_sq + sigma2_sq + C2)
    )

    # Sum over rows (H) -> (1, P*W); scaled so the wrapper only sums the W
    # lanes of each plane to get its spatial mean. Lane-dense store.
    out_ref[0] = jnp.sum(ssim_map, axis=0, keepdims=True) * inv_hw


def ssim_pallas(img1, img2, *, w_size: int = 11, size_average: bool = True):
    """SSIM forward pass. img1, img2: (N, C, H, W), same shape."""
    assert img1.shape == img2.shape
    N, C, H, W = img1.shape
    NC = N * C

    # Pack P planes along the lane axis so the lane dim is >= 128 (vreg-dense).
    P = max(1, -(-128 // W))
    G = -(-NC // P)                  # number of grid steps (plane groups)
    NCp = G * P
    PW = P * W

    # Compile-time banded conv matrices (Gaussian sigma=1.5, zero padding folded in).
    g = _gaussian_1d(w_size, 1.5)
    av = _band_conv_matrix(H, g)                       # left factor:  Av @ X
    aht = _band_conv_matrix(W, g).T                    # right factor: X @ AhT
    bhb = np.kron(np.eye(P, dtype=np.float32), aht)    # block-diag over packed planes

    # Fuse the five convolved quantities into one slab when the stacked row
    # count still fits a single MXU pass; otherwise per-quantity convs.
    fused = (5 * H) <= 128
    av_mat = np.kron(np.eye(5, dtype=np.float32), av) if fused else av
    AH = av_mat.shape[0]

    def to_slabs(x):
        x = x.astype(jnp.float32).reshape(NC, H, W)
        if NCp != NC:   # pad with zero planes (dropped again after the kernel)
            x = jnp.concatenate([x, jnp.zeros((NCp - NC, H, W), jnp.float32)], axis=0)
        # (G, P, H, W) -> (G, H, P, W) -> (G, H, P*W): planes onto the lane axis.
        return x.reshape(G, P, H, W).transpose(0, 2, 1, 3).reshape(G, H, PW)

    x1 = to_slabs(img1)
    x2 = to_slabs(img2)

    kernel = functools.partial(
        _ssim_kernel, h=H, inv_hw=1.0 / float(H * W), fused=fused)

    lane_means = pl.pallas_call(
        kernel,
        out_shape=jax.ShapeDtypeStruct((G, 1, PW), jnp.float32),
        grid_spec=pltpu.PrefetchScalarGridSpec(
            num_scalar_prefetch=0,
            grid=(G,),
            in_specs=[
                pl.BlockSpec((1, H, PW), lambda i: (i, 0, 0)),
                pl.BlockSpec((1, H, PW), lambda i: (i, 0, 0)),
                pl.BlockSpec((AH, AH), lambda i: (0, 0)),    # same block each step (resident)
                pl.BlockSpec((PW, PW), lambda i: (0, 0)),    # same block each step (resident)
            ],
            out_specs=pl.BlockSpec((1, 1, PW), lambda i: (i, 0, 0)),
        ),
        compiler_params=pltpu.CompilerParams(
            dimension_semantics=("parallel",),  # shard plane groups across TCs
        ),
    )(x1, x2, jnp.asarray(av_mat), jnp.asarray(bhb))

    # Finish the tiny reductions in XLA: per-plane -> per-sample -> scalar.
    per_plane = lane_means.reshape(NCp, W).sum(axis=1)[:NC]    # (NC,) spatial means
    per_sample = per_plane.reshape(N, C).mean(axis=1)          # == ssim_map.mean(1).mean(1).mean(1)
    if size_average:
        return per_sample.mean()                               # == ssim_map.mean()
    return per_sample


def _ssim_reference(img1, img2, *, w_size: int = 11, size_average: bool = True):
    """Pure-JAX reference (depthwise conv, zero padding) mirroring the PyTorch module."""
    N, C, H, W = img1.shape
    p = w_size // 2
    g = _gaussian_1d(w_size, 1.5)
    w2d = np.outer(g, g).astype(np.float32)
    w = jnp.asarray(np.tile(w2d[None, None], (C, 1, 1, 1)))    # (C,1,K,K) depthwise

    x1 = img1.astype(jnp.float32)
    x2 = img2.astype(jnp.float32)

    def conv(x):
        return lax.conv_general_dilated(
            x, w, window_strides=(1, 1), padding=[(p, p), (p, p)],
            dimension_numbers=("NCHW", "OIHW", "NCHW"), feature_group_count=C)

    mu1, mu2 = conv(x1), conv(x2)
    mu1_sq, mu2_sq, mu1_mu2 = mu1 * mu1, mu2 * mu2, mu1 * mu2
    sigma1_sq = conv(x1 * x1) - mu1_sq
    sigma2_sq = conv(x2 * x2) - mu2_sq
    sigma12 = conv(x1 * x2) - mu1_mu2
    C1, C2 = 0.01 ** 2, 0.03 ** 2
    ssim_map = ((2 * mu1_mu2 + C1) * (2 * sigma12 + C2)) / (
        (mu1_sq + mu2_sq + C1) * (sigma1_sq + sigma2_sq + C2))
    if size_average:
        return ssim_map.mean()
    return ssim_map.mean(axis=(1, 2, 3))


if __name__ == "__main__":
    key = jax.random.PRNGKey(0)
    k1, k2 = jax.random.split(key)
    N, C, H, W = 2, 4, 16, 16
    img1 = jax.random.uniform(k1, (N, C, H, W), dtype=jnp.float32)
    img2 = jax.random.uniform(k2, (N, C, H, W), dtype=jnp.float32)

    out = ssim_pallas(img1, img2, w_size=11, size_average=True)
    jax.block_until_ready(out)

    ref = _ssim_reference(img1, img2, w_size=11, size_average=True)
    np.testing.assert_allclose(np.asarray(out), np.asarray(ref), rtol=1e-4, atol=1e-5)

    print("KERNEL_OK")
</pallas_src>

<mosaic_0001>
module attributes {stable_mosaic.version = 11 : i64} {
  func.func @_ssim_kernel(%arg0: i32, %arg1: memref<1x16x128xf32, #tpu.memory_space<vmem>>, %arg2: memref<1x16x128xf32, #tpu.memory_space<vmem>>, %arg3: memref<80x80xf32, #tpu.memory_space<vmem>>, %arg4: memref<128x128xf32, #tpu.memory_space<vmem>>, %arg5: memref<1x1x128xf32, #tpu.memory_space<vmem>>) attributes {dimension_semantics = [#tpu.dimension_semantics<parallel>], iteration_bounds = array<i64: 1>, scalar_prefetch = 0 : i64, scratch_operands = 0 : i64, tpu.core_type = #tpu.core_type<tc>, window_params = [{transform_indices = @transform_0, window_bounds = array<i64: 1, 16, 128>}, {transform_indices = @transform_1, window_bounds = array<i64: 1, 16, 128>}, {pipeline_mode = #tpu.pipeline_mode<synchronous>, transform_indices = @transform_2, window_bounds = array<i64: 80, 80>}, {pipeline_mode = #tpu.pipeline_mode<synchronous>, transform_indices = @transform_3, window_bounds = array<i64: 128, 128>}, {transform_indices = @transform_4, window_bounds = array<i64: 1, 1, 128>}]} {
    %c0 = arith.constant 0 : index
    %c0_0 = arith.constant 0 : index
    %c0_1 = arith.constant 0 : index
    %0 = vector.load %arg1[%c0, %c0_0, %c0_1] : memref<1x16x128xf32, #tpu.memory_space<vmem>>, vector<1x16x128xf32>
    %1 = vector.shape_cast %0 : vector<1x16x128xf32> to vector<16x128xf32>
    %c0_2 = arith.constant 0 : index
    %c0_3 = arith.constant 0 : index
    %c0_4 = arith.constant 0 : index
    %2 = vector.load %arg2[%c0_2, %c0_3, %c0_4] : memref<1x16x128xf32, #tpu.memory_space<vmem>>, vector<1x16x128xf32>
    %3 = vector.shape_cast %2 : vector<1x16x128xf32> to vector<16x128xf32>
    %c0_5 = arith.constant 0 : index
    %c0_6 = arith.constant 0 : index
    %4 = vector.load %arg3[%c0_5, %c0_6] : memref<80x80xf32, #tpu.memory_space<vmem>>, vector<80x80xf32>
    %c0_7 = arith.constant 0 : index
    %c0_8 = arith.constant 0 : index
    %5 = vector.load %arg4[%c0_7, %c0_8] : memref<128x128xf32, #tpu.memory_space<vmem>>, vector<128x128xf32>
    %6 = arith.mulf %1, %1 : vector<16x128xf32>
    %7 = arith.mulf %3, %3 : vector<16x128xf32>
    %8 = arith.mulf %1, %3 : vector<16x128xf32>
    %9 = tpu.concatenate %1, %3, %6, %7, %8 in 0 : vector<16x128xf32>, vector<16x128xf32>, vector<16x128xf32>, vector<16x128xf32>, vector<16x128xf32> -> vector<80x128xf32>
    %cst = arith.constant dense<0.000000e+00> : vector<80x128xf32>
    %10 = tpu.matmul %4, %9, %cst {dimension_numbers = #tpu.dot_dimension_numbers<[1], [0], [0], [1], [0, 0, 1, 1], [], []>} : vector<80x80xf32>, vector<80x128xf32>, vector<80x128xf32> -> vector<80x128xf32>
    %cst_9 = arith.constant dense<0.000000e+00> : vector<80x128xf32>
    %11 = tpu.matmul %10, %5, %cst_9 {dimension_numbers = #tpu.dot_dimension_numbers<[1], [0], [0], [1], [0, 0, 1, 1], [], []>} : vector<80x128xf32>, vector<128x128xf32>, vector<80x128xf32> -> vector<80x128xf32>
    %12 = vector.extract_strided_slice %11 {offsets = [0, 0], sizes = [16, 128], strides = [1, 1]} : vector<80x128xf32> to vector<16x128xf32>
    %13 = vector.extract_strided_slice %11 {offsets = [16, 0], sizes = [16, 128], strides = [1, 1]} : vector<80x128xf32> to vector<16x128xf32>
    %14 = vector.extract_strided_slice %11 {offsets = [32, 0], sizes = [16, 128], strides = [1, 1]} : vector<80x128xf32> to vector<16x128xf32>
    %15 = vector.extract_strided_slice %11 {offsets = [48, 0], sizes = [16, 128], strides = [1, 1]} : vector<80x128xf32> to vector<16x128xf32>
    %16 = vector.extract_strided_slice %11 {offsets = [64, 0], sizes = [16, 128], strides = [1, 1]} : vector<80x128xf32> to vector<16x128xf32>
    %17 = arith.mulf %12, %12 : vector<16x128xf32>
    %18 = arith.mulf %13, %13 : vector<16x128xf32>
    %19 = arith.mulf %12, %13 : vector<16x128xf32>
    %20 = arith.subf %14, %17 : vector<16x128xf32>
    %21 = arith.subf %15, %18 : vector<16x128xf32>
    %22 = arith.subf %16, %19 : vector<16x128xf32>
    %cst_10 = arith.constant 2.000000e+00 : f32
    %23 = vector.broadcast %cst_10 : f32 to vector<16x128xf32>
    %24 = arith.mulf %23, %19 : vector<16x128xf32>
    %cst_11 = arith.constant 9.99999974E-5 : f32
    %25 = vector.broadcast %cst_11 : f32 to vector<16x128xf32>
    %26 = arith.addf %24, %25 : vector<16x128xf32>
    %cst_12 = arith.constant 2.000000e+00 : f32
    %27 = vector.broadcast %cst_12 : f32 to vector<16x128xf32>
    %28 = arith.mulf %27, %22 : vector<16x128xf32>
    %cst_13 = arith.constant 8.99999984E-4 : f32
    %29 = vector.broadcast %cst_13 : f32 to vector<16x128xf32>
    %30 = arith.addf %28, %29 : vector<16x128xf32>
    %31 = arith.mulf %26, %30 : vector<16x128xf32>
    %32 = arith.addf %17, %18 : vector<16x128xf32>
    %cst_14 = arith.constant 9.99999974E-5 : f32
    %33 = vector.broadcast %cst_14 : f32 to vector<16x128xf32>
    %34 = arith.addf %32, %33 : vector<16x128xf32>
    %35 = arith.addf %20, %21 : vector<16x128xf32>
    %cst_15 = arith.constant 8.99999984E-4 : f32
    %36 = vector.broadcast %cst_15 : f32 to vector<16x128xf32>
    %37 = arith.addf %35, %36 : vector<16x128xf32>
    %38 = arith.mulf %34, %37 : vector<16x128xf32>
    %39 = arith.divf %31, %38 : vector<16x128xf32>
    %cst_16 = arith.constant dense<0.000000e+00> : vector<128xf32>
    %40 = vector.multi_reduction <add>, %39, %cst_16 [0] : vector<16x128xf32> to vector<128xf32>
    %41 = vector.shape_cast %40 : vector<128xf32> to vector<1x128xf32>
    %cst_17 = arith.constant 3.906250e-03 : f32
    %42 = vector.broadcast %cst_17 : f32 to vector<1x128xf32>
    %43 = arith.mulf %41, %42 : vector<1x128xf32>
    %c0_18 = arith.constant 0 : index
    %c0_19 = arith.constant 0 : index
    %c0_20 = arith.constant 0 : index
    %44 = vector.load %arg5[%c0_18, %c0_19, %c0_20] : memref<1x1x128xf32, #tpu.memory_space<vmem>>, vector<1x1x128xf32>
    %45 = vector.shape_cast %44 : vector<1x1x128xf32> to vector<1x128xf32>
    %46 = vector.shape_cast %43 : vector<1x128xf32> to vector<1x1x128xf32>
    tpu.vector_store %arg5[%c0_18, %c0_19, %c0_20], %46 {strides = array<i32>} : memref<1x1x128xf32, #tpu.memory_space<vmem>>, vector<1x1x128xf32>,
    return
  }
  func.func @transform_0(%arg0: i32) -> (i32, i32, i32) {
    %c0_i32 = arith.constant 0 : i32
    %c0_i32_0 = arith.constant 0 : i32
    %c0_i32_1 = arith.constant 0 : i32
    return %arg0, %c0_i32, %c0_i32_0 : i32, i32, i32
  }
  func.func @transform_1(%arg0: i32) -> (i32, i32, i32) {
    %c0_i32 = arith.constant 0 : i32
    %c0_i32_0 = arith.constant 0 : i32
    %c0_i32_1 = arith.constant 0 : i32
    return %arg0, %c0_i32, %c0_i32_0 : i32, i32, i32
  }
  func.func @transform_2(%arg0: i32) -> (i32, i32) {
    %c0_i32 = arith.constant 0 : i32
    %c0_i32_0 = arith.constant 0 : i32
    %c0_i32_1 = arith.constant 0 : i32
    return %c0_i32, %c0_i32_0 : i32, i32
  }
  func.func @transform_3(%arg0: i32) -> (i32, i32) {
    %c0_i32 = arith.constant 0 : i32
    %c0_i32_0 = arith.constant 0 : i32
    %c0_i32_1 = arith.constant 0 : i32
    return %c0_i32, %c0_i32_0 : i32, i32
  }
  func.func @transform_4(%arg0: i32) -> (i32, i32, i32) {
    %c0_i32 = arith.constant 0 : i32
    %c0_i32_0 = arith.constant 0 : i32
    %c0_i32_1 = arith.constant 0 : i32
    return %arg0, %c0_i32, %c0_i32_0 : i32, i32, i32
  }
}

</mosaic_0001>

<bundles_post_ra>
// kernel: tpu_custom_call.1
= control target key start
LH: loop header
LB: loop body
LE: loop exit
PB: predicated region body
PF: predicated region fallthrough
CT: control target
= control target key end

     0   :  { %9 = vsyncpa [#allocation3], 0  ;;  %s879_s0 = inlined_call_operand.hbm [shape: f32[1,16,128], index: 0, kind: input, shape index: {}]   ;;  %s880_s1 = inlined_call_operand.hbm [shape: f32[1,16,128], index: 1, kind: input, shape index: {}]   ;;  %s881_s2 = inlined_call_operand.hbm [shape: f32[80,80], index: 2, kind: input, shape index: {}]   ;;  %s882_s3 = inlined_call_operand.hbm [shape: f32[128,128], index: 3, kind: input, shape index: {}]   ;;  %s883_s4 = inlined_call_operand.hbm [shape: f32[1,1,128], index: 4, kind: output, shape index: {}]  }
   0x1   :  { %10 = vsyncpa [#allocation6], 0 }
   0x2   :  { %11 = vsyncpa [#allocation9], 0 }
   0x3   :  { %12 = vsyncpa [#allocation4], 0  ;;  %s751_s15 = smov [#allocation5]   ;;  %s752_s17 = smov [#allocation2]  }
   0x4   :  { %s30_s16 = sshll.u32 %s751_s15, 4  ;;  %s18_s18 = sshll.u32 %s752_s17, 4  ;;  %s31_s16 = int_to_ptr.vmem [resolvable:$true] %s30_s16  ;;  %s783_s18 = int_to_ptr.vmem [resolvable:$true] %s18_s18 }
   0x5   :  { %s633_s21 = scalar_lea.hbm %s880_s1, 256 }
   0x6   :  { %p634_p0 = scmp.ne.s32.totalorder %s880_s1, %s633_s21  ;;  %p637_p1 = scmp.lt.u32.totalorder %s633_s21, %s880_s1 }
   0x8   :  { %p639_p2 = pnand %p637_p1, %p634_p0 }
   0xa   :  { %642 = shalt.err (!%p639_p2)
}
   0xb   :  { %s643_s26 = scalar_lea.vmem %s31_s16, 256  ;;  %p648_p4 = scmp.lt.s32.totalorder %s31_s16, %s31_s16 }
   0xc   :  { %p644_p3 = scmp.ne.s32.totalorder %s31_s16, %s643_s26  ;;  %p649_p5 = scmp.lt.s32.totalorder %s643_s26, %s643_s26 }
   0xe   :  { %p650_p6 = por %p649_p5, %p648_p4 }
  0x10   :  { %p651_p7 = pnand %p650_p6, %p644_p3 }
  0x12   :  { %654 = shalt.err (!%p651_p7)
}
  0x13   :  { %s753_s27 = smov 128   ;;  %s754_s28 = smov 8  }
  0x14   :  { %36 = dma.hbm_to_vmem [thread:$0]  %s880_s1, 256, %s31_s16, [#allocation6], %s753_s27, %s753_s27, %s754_s28  }
  0x15   :  { %s655_s7 = scalar_lea.hbm %s879_s0, 256 }
  0x16   :  { %p656_p8 = scmp.ne.s32.totalorder %s879_s0, %s655_s7  ;;  %p659_p9 = scmp.lt.u32.totalorder %s655_s7, %s879_s0 }
  0x18   :  { %p661_p10 = pnand %p659_p9, %p656_p8 }
  0x1a   :  { %664 = shalt.err (!%p661_p10)
}
  0x1b   :  { %s665_s12 = scalar_lea.vmem %s783_s18, 256  ;;  %p670_p12 = scmp.lt.s32.totalorder %s783_s18, %s783_s18 }
  0x1c   :  { %p666_p11 = scmp.ne.s32.totalorder %s783_s18, %s665_s12  ;;  %p671_p13 = scmp.lt.s32.totalorder %s665_s12, %s665_s12 }
  0x1e   :  { %p672_p0 = por %p671_p13, %p670_p12 }
  0x20   :  { %p673_p1 = pnand %p672_p0, %p666_p11 }
  0x22   :  { %676 = shalt.err (!%p673_p1)
}
  0x23   :  { %24 = dma.hbm_to_vmem [thread:$0]  %s879_s0, 256, %s783_s18, [#allocation3], %s753_s27, %s753_s27, %s754_s28  }
  0x24   :  { %s755_s14 = smov [#allocation7]   ;;  %s756_s16 = smov [#allocation8]  }
  0x25   :  { %s42_s15 = sshll.u32 %s755_s14, 4  ;;  %s54_s17 = sshll.u32 %s756_s16, 4  ;;  %s43_s15 = int_to_ptr.vmem [resolvable:$true] %s42_s15  ;;  %s820_s17 = int_to_ptr.vmem [resolvable:$true] %s54_s17 }
  0x26   :  { %s677_s21 = scalar_lea.hbm %s881_s2, 1280 }
  0x27   :  { %p678_p2 = scmp.ne.s32.totalorder %s881_s2, %s677_s21  ;;  %p681_p3 = scmp.lt.u32.totalorder %s677_s21, %s881_s2 }
  0x29   :  { %p683_p4 = pnand %p681_p3, %p678_p2 }
  0x2b   :  { %686 = shalt.err (!%p683_p4)
}
  0x2c   :  { %s687_s0 = scalar_lea.vmem %s43_s15, 1280  ;;  %p692_p6 = scmp.lt.s32.totalorder %s43_s15, %s43_s15 }
  0x2d   :  { %p688_p5 = scmp.ne.s32.totalorder %s43_s15, %s687_s0  ;;  %p693_p7 = scmp.lt.s32.totalorder %s687_s0, %s687_s0 }
  0x2f   :  { %p694_p8 = por %p693_p7, %p692_p6 }
  0x31   :  { %p695_p9 = pnand %p694_p8, %p688_p5 }
  0x33   :  { %698 = shalt.err (!%p695_p9)
}
  0x34   :  { %48 = dma.hbm_to_vmem [thread:$0]  %s881_s2, 1280, %s43_s15, [#allocation6], %s753_s27, %s753_s27, %s754_s28  }
  0x35   :  { %s699_s5 = scalar_lea.hbm %s882_s3, 2048 }
  0x36   :  { %p700_p10 = scmp.ne.s32.totalorder %s882_s3, %s699_s5  ;;  %p703_p11 = scmp.lt.u32.totalorder %s699_s5, %s882_s3 }
  0x38   :  { %p705_p12 = pnand %p703_p11, %p700_p10 }
  0x3a   :  { %708 = shalt.err (!%p705_p12)
}
  0x3b   :  { %s709_s10 = scalar_lea.vmem %s820_s17, 2048  ;;  %p714_p0 = scmp.lt.s32.totalorder %s820_s17, %s820_s17 }
  0x3c   :  { %p710_p13 = scmp.ne.s32.totalorder %s820_s17, %s709_s10  ;;  %p715_p1 = scmp.lt.s32.totalorder %s709_s10, %s709_s10 }
  0x3e   :  { %p716_p2 = por %p715_p1, %p714_p0 }
  0x40   :  { %p717_p3 = pnand %p716_p2, %p710_p13 }
  0x42   :  { %720 = shalt.err (!%p717_p3)
}
  0x43   :  { %60 = dma.hbm_to_vmem [thread:$0]  %s882_s3, 2048, %s820_s17, [#allocation9], %s753_s27, %s753_s27, %s754_s28  }
  0x44   :  { %743 = dma.done.wait [#allocation3], 256  }
  0x45   :  { %744 = vsyncadd [#allocation3], 4294967040 }
  0x46   :  { %745 = dma.done.wait [#allocation6], 1536  }
  0x47   :  { %746 = vsyncadd [#allocation6], 4294965760 }
  0x48   :  { %747 = dma.done.wait [#allocation9], 2048  }
  0x49   :  { %748 = vsyncadd [#allocation9], 4294965248  ;;  %vm109_vm0 = vcmask 654336   ;;  %v73_v0 = vld [vmem:[#allocation2] sm:$0xff]  ;;  %v74_v1 = vld [vmem:[#allocation2 + $0x8] sm:$0xff]  ;;  %s757_s3 = smov [#allocation10]  }
  0x4a   :  { %v75_v2 = vld [vmem:[#allocation5] sm:$0xff]  ;;  %v570_v3 = vpack.c.bf16 %v74_v1, %v73_v0  ;;  %v76_v4 = vld [vmem:[#allocation5 + $0x8] sm:$0xff]  ;;  %v103_v5 = vmul.f32 %v73_v0, %v73_v0  ;;  %v104_v6 = vmul.f32 %v74_v1, %v74_v1  ;;  %v77_v7 = vld [vmem:[#allocation7] sm:$0xff]  ;;  %s421_s27 = sshll.u32 %s757_s3, 4  ;;  %s422_s27 = int_to_ptr.vmem [resolvable:$true] %s421_s27 }
  0x4b   :  { %v574_v8 = vpack.c.bf16 %v76_v4, %v75_v2  ;;  %508 = vmatprep.mubr.msk.f32.mxu0 %vm109_vm0, %v77_v7  ;;  %v87_v9 = vld [vmem:[#allocation8] sm:$0xff]  ;;  %v105_v11 = vmul.f32 %v75_v2, %v75_v2  ;;  %v106_v12 = vmul.f32 %v76_v4, %v76_v4  ;;  %v88_v13 = vld [vmem:[#allocation8 + $0x8] sm:$0xff]  ;;  %v89_v14 = vld [vmem:[#allocation8 + $0x10] sm:$0xff]  ;;  %v107_v21 = vmul.f32 %v75_v2, %v73_v0  ;;  %s721_s28 = scalar_lea.vmem %s422_s27, 16  ;;  %s725_s12 = scalar_lea.vmem %s422_s27, 32 }
  0x4c   :  { %571 = vmatprep.subr.bf16.mxu0 %v570_v3  ;;  %v578_v10 = vpack.c.bf16 %v104_v6, %v103_v5  ;;  %v90_v15 = vld [vmem:[#allocation8 + $0x18] sm:$0xff]  ;;  %v590_v16 = vpack.c.bf16 %v88_v13, %v87_v9  ;;  %v91_v18 = vld [vmem:[#allocation8 + $0x20] sm:$0xff]  ;;  %v92_v19 = vld [vmem:[#allocation8 + $0x28] sm:$0xff]  ;;  %v108_v22 = vmul.f32 %v76_v4, %v74_v1  ;;  %p722_p4 = scmp.ne.s32.totalorder %s422_s27, %s721_s28  ;;  %p726_p5 = scmp.lt.s32.totalorder %s422_s27, %s422_s27 }
  0x4d   :  { %573 = vmatpush3.bf16.msra.mxu0 %v570_v3  ;;  %v594_v17 = vpack.c.bf16 %v90_v15, %v89_v14  ;;  %v582_v20 = vpack.c.bf16 %v106_v12, %v105_v11  ;;  %v598_v23 = vpack.c.bf16 %v92_v19, %v91_v18  ;;  %v93_v24 = vld [vmem:[#allocation8 + $0x30] sm:$0xff]  ;;  %v94_v25 = vld [vmem:[#allocation8 + $0x38] sm:$0xff]  ;;  %v95_v28 = vld [vmem:[#allocation8 + $0x40] sm:$0xff]  ;;  %p727_p6 = scmp.lt.s32.totalorder %s725_s12, %s721_s28 }
  0x4e   :  { %575 = vmatprep.subr.bf16.mxu0 %v574_v8  ;;  %591 = vmatprep.subr.bf16.mxu1 %v590_v16  ;;  %v586_v26 = vpack.c.bf16 %v108_v22, %v107_v21  ;;  %v602_v27 = vpack.c.bf16 %v94_v25, %v93_v24  ;;  %v96_v29 = vld [vmem:[#allocation8 + $0x48] sm:$0xff]  ;;  %v97_v31 = vld [vmem:[#allocation8 + $0x50] sm:$0xff]  ;;  %v98_v32 = vld [vmem:[#allocation8 + $0x58] sm:$0xff] }
  0x4f   :  { %593 = vmatpush3.bf16.msra.mxu1 %v590_v16  ;;  %v606_v30 = vpack.c.bf16 %v96_v29, %v95_v28  ;;  %v78_v33 = vld [vmem:[#allocation7 + $0x8] sm:$0xff]  ;;  %v79_v34 = vld [vmem:[#allocation7 + $0x10] sm:$0xff]  ;;  %v610_v35 = vpack.c.bf16 %v98_v32, %v97_v31  ;;  %v100_v37 = vld [vmem:[#allocation8 + $0x68] sm:$0xff]  ;;  %p728_p7 = por %p727_p6, %p726_p5 }
  0x50   :  { %595 = vmatprep.subr.bf16.mxu1 %v594_v17  ;;  %v99_v36 = vld [vmem:[#allocation8 + $0x60] sm:$0xff]  ;;  %v80_v38 = vld [vmem:[#allocation7 + $0x18] sm:$0xff]  ;;  %v81_v39 = vld [vmem:[#allocation7 + $0x20] sm:$0xff] }
  0x51   :  { %577 = vmatpush3.bf16.msra.mxu0 %v574_v8  ;;  %v614_v40 = vpack.c.bf16 %v100_v37, %v99_v36  ;;  %v101_v41 = vld [vmem:[#allocation8 + $0x70] sm:$0xff]  ;;  %v102_v42 = vld [vmem:[#allocation8 + $0x78] sm:$0xff]  ;;  %v83_v44 = vld [vmem:[#allocation7 + $0x30] sm:$0xff]  ;;  %p729_p8 = pnand %p728_p7, %p722_p4 }
  0x52   :  { %579 = vmatprep.subr.bf16.mxu0 %v578_v10  ;;  %v82_v43 = vld [vmem:[#allocation7 + $0x28] sm:$0xff]  ;;  %v618_v45 = vpack.c.bf16 %v102_v42, %v101_v41  ;;  %v84_v46 = vld [vmem:[#allocation7 + $0x38] sm:$0xff]  ;;  %v85_v47 = vld [vmem:[#allocation7 + $0x40] sm:$0xff] }
  0x53   :  { %597 = vmatpush3.bf16.msra.mxu1 %v594_v17  ;;  %v86_v48 = vld [vmem:[#allocation7 + $0x48] sm:$0xff] }
  0x54   :  { %599 = vmatprep.subr.bf16.mxu1 %v598_v23 }
  0x55   :  { %581 = vmatpush3.bf16.msra.mxu0 %v578_v10 }
  0x56   :  { %583 = vmatprep.subr.bf16.mxu0 %v582_v20 }
  0x57   :  { %601 = vmatpush3.bf16.msra.mxu1 %v598_v23 }
  0x58   :  { %603 = vmatprep.subr.bf16.mxu1 %v602_v27 }
  0x59   :  { %585 = vmatpush3.bf16.msra.mxu0 %v582_v20 }
  0x5a   :  { %587 = vmatprep.subr.bf16.mxu0 %v586_v26 }
  0x5b   :  { %605 = vmatpush3.bf16.msra.mxu1 %v602_v27 }
  0x5c   :  { %607 = vmatprep.subr.bf16.mxu1 %v606_v30 }
  0x5d   :  { %589 = vmatpush3.bf16.msra.mxu0 %v586_v26 }
  0x5f   :  { %609 = vmatpush3.bf16.msra.mxu1 %v606_v30 }
  0x60   :  { %509 = vmatmul.mubr.msk.f32.vlgmr.msra.gmra.mrb[0].mxu0 %vm109_vm0, %v78_v33  ;;  %611 = vmatprep.subr.bf16.mxu1 %v610_v35 }
  0x61   :  { %511 = vmatprep.mubr.msk.f32.mxu0 %vm109_vm0, %v79_v34 }
  0x63   :  { %613 = vmatpush3.bf16.msra.mxu1 %v610_v35 }
  0x64   :  { %512 = vmatmul.mubr.msk.f32.gmra.mrb[2].mxu0 %vm109_vm0, %v80_v38  ;;  %615 = vmatprep.subr.bf16.mxu1 %v614_v40 }
  0x65   :  { %514 = vmatprep.mubr.msk.f32.mxu0 %vm109_vm0, %v81_v39 }
  0x67   :  { %617 = vmatpush3.bf16.msra.mxu1 %v614_v40 }
  0x68   :  { %515 = vmatmul.mubr.msk.f32.gmra.mrb[4].mxu0 %vm109_vm0, %v82_v43  ;;  %619 = vmatprep.subr.bf16.mxu1 %v618_v45 }
  0x69   :  { %517 = vmatprep.mubr.msk.f32.mxu0 %vm109_vm0, %v83_v44 }
  0x6b   :  { %621 = vmatpush3.bf16.msra.mxu1 %v618_v45 }
  0x6c   :  { %518 = vmatmul.mubr.msk.f32.gmra.mrb[6].mxu0 %vm109_vm0, %v84_v46 }
  0x6d   :  { %520 = vmatprep.mubr.msk.f32.mxu0 %vm109_vm0, %v85_v47 }
  0x70   :  { %521 = vmatmul.mubr.msk.f32.gmra.mrb[8].mxu0 %vm109_vm0, %v86_v48 }
 0x133   :  { %v510_v49 = vpop.f32.mrb[0].mxu0 }
 0x134   :  { %v206_v50 = vpop.f32.mrb[1].mxu0 }
 0x135   :  { %555 = vmatprep.mubr.f32.mxu1 %v206_v50 }
 0x136   :  { %556 = vmatmul.mubr.f32.vlgmr.msra.gmra.mrb[0].mxu1 %v510_v49 }
 0x137   :  { %v513_v51 = vpop.f32.mrb[2].mxu0 }
 0x138   :  { %v216_v52 = vpop.f32.mrb[3].mxu0 }
 0x139   :  { %558 = vmatprep.mubr.f32.mxu1 %v216_v52 }
 0x13a   :  { %559 = vmatmul.mubr.f32.gmra.mrb[2].mxu1 %v513_v51 }
 0x13b   :  { %v516_v53 = vpop.f32.mrb[4].mxu0 }
 0x13c   :  { %v226_v54 = vpop.f32.mrb[5].mxu0 }
 0x13d   :  { %561 = vmatprep.mubr.f32.mxu1 %v226_v54 }
 0x13e   :  { %562 = vmatmul.mubr.f32.gmra.mrb[4].mxu1 %v516_v53 }
 0x13f   :  { %v519_v55 = vpop.f32.mrb[6].mxu0 }
 0x140   :  { %v236_v56 = vpop.f32.mrb[7].mxu0 }
 0x141   :  { %564 = vmatprep.mubr.f32.mxu1 %v236_v56 }
 0x142   :  { %565 = vmatmul.mubr.f32.gmra.mrb[6].mxu1 %v519_v55 }
 0x143   :  { %v522_v57 = vpop.f32.mrb[8].mxu0 }
 0x144   :  { %v246_v58 = vpop.f32.mrb[9].mxu0 }
 0x145   :  { %567 = vmatprep.mubr.f32.mxu1 %v246_v58 }
 0x146   :  { %568 = vmatmul.mubr.f32.gmra.mrb[8].mxu1 %v522_v57 }
 0x209   :  { %v557_v59 = vpop.f32.mrb[0].mxu1 }
 0x20a   :  { %v321_v60 = vpop.f32.mrb[1].mxu1  ;;  %v371_v62 = vmul.f32 %v557_v59, %v557_v59 }
 0x20b   :  { %v370_v2 = vmul.f32 %v321_v60, %v321_v60 }
 0x20d   :  { %v560_v61 = vpop.f32.mrb[2].mxu1 }
 0x20e   :  { %v373_v63 = vmul.f32 %v560_v61, %v560_v61  ;;  %v375_v0 = vmul.f32 %v560_v61, %v557_v59  ;;  %v331_v1 = vpop.f32.mrb[3].mxu1 }
 0x20f   :  { %v372_v3 = vmul.f32 %v331_v1, %v331_v1  ;;  %v374_v4 = vmul.f32 %v331_v1, %v321_v60 }
 0x210   :  { %v393_v5 = vadd.f32 %v373_v63, %v371_v62  ;;  %v383_v18 = vmul.f32 2.0, %v375_v0 }
 0x211   :  { %v392_v6 = vadd.f32 %v372_v3, %v370_v2  ;;  %v563_v7 = vpop.f32.mrb[4].mxu1  ;;  %v382_v23 = vmul.f32 2.0, %v374_v4 }
 0x212   :  { %v377_v8 = vsub.f32 %v563_v7, %v371_v62  ;;  %v341_v9 = vpop.f32.mrb[5].mxu1  ;;  %v395_v19 = vadd.f32 0.0001, %v393_v5  ;;  %v385_v31 = vadd.f32 0.0001, %v383_v18 }
 0x213   :  { %v376_v10 = vsub.f32 %v341_v9, %v370_v2  ;;  %v394_v24 = vadd.f32 0.0001, %v392_v6  ;;  %v384_v33 = vadd.f32 0.0001, %v382_v23 }
 0x215   :  { %v566_v11 = vpop.f32.mrb[6].mxu1 }
 0x216   :  { %v379_v12 = vsub.f32 %v566_v11, %v373_v63  ;;  %v351_v13 = vpop.f32.mrb[7].mxu1 }
 0x217   :  { %v378_v14 = vsub.f32 %v351_v13, %v372_v3 }
 0x218   :  { %v397_v15 = vadd.f32 %v379_v12, %v377_v8 }
 0x219   :  { %v396_v16 = vadd.f32 %v378_v14, %v376_v10  ;;  %v569_v17 = vpop.f32.mrb[8].mxu1 }
 0x21a   :  { %v399_v20 = vadd.f32 0.0009, %v397_v15  ;;  %v381_v21 = vsub.f32 %v569_v17, %v375_v0  ;;  %v361_v22 = vpop.f32.mrb[9].mxu1 }
 0x21b   :  { %v398_v25 = vadd.f32 0.0009, %v396_v16  ;;  %v380_v26 = vsub.f32 %v361_v22, %v374_v4 }
 0x21c   :  { %v401_v27 = vmul.f32 %v399_v20, %v395_v19  ;;  %v387_v28 = vmul.f32 2.0, %v381_v21 }
 0x21d   :  { %v400_v29 = vmul.f32 %v398_v25, %v394_v24  ;;  %v386_v30 = vmul.f32 2.0, %v380_v26 }
 0x21e   :  { %629 = vrcp.f32 %v401_v27  ;;  %v389_v32 = vadd.f32 0.0009, %v387_v28 }
 0x21f   :  { %631 = vrcp.f32 %v400_v29  ;;  %v388_v34 = vadd.f32 0.0009, %v386_v30 }
 0x220   :  { %v391_v35 = vmul.f32 %v389_v32, %v385_v31 }
 0x221   :  { %v390_v36 = vmul.f32 %v388_v34, %v384_v33 }
 0x228   :  { %v630_v37 = vpop.eup %629 }
 0x229   :  { %v632_v38 = vpop.eup %631  ;;  %v405_v39 = vmul.f32 %v630_v37, %v391_v35 }
 0x22a   :  { %v403_v40 = vmul.f32 %v632_v38, %v390_v36 }
 0x22c   :  { %v406_v41 = vadd.f32 %v405_v39, %v403_v40 }
 0x22e   :  { %v407_v42 = vrot.slane %v406_v41, 4 }
 0x230   :  { %v408_v43 = vadd.f32 %v407_v42, %v406_v41 }
 0x232   :  { %v409_v44 = vrot.slane %v408_v43, 2 }
 0x234   :  { %v410_v45 = vadd.f32 %v409_v44, %v408_v43 }
 0x236   :  { %v411_v46 = vrot.slane %v410_v45, 1 }
 0x238   :  { %v412_v47 = vadd.f32 %v411_v46, %v410_v45 }
 0x23a   :  { %v413_v48 = vmul.f32 0.00390625, %v412_v47 }
 0x23c   :  { %414 = vst [vmem:[#allocation10] sm:$0x1] %v413_v48 }
 0x23d   :  { %732 = shalt.err (!%p729_p8)
}
 0x23e   :  { %s733_s14 = scalar_lea.hbm %s883_s4, 16 }
 0x23f   :  { %p734_p9 = scmp.ne.s32.totalorder %s883_s4, %s733_s14  ;;  %p737_p10 = scmp.lt.u32.totalorder %s733_s14, %s883_s4 }
 0x241   :  { %p739_p11 = pnand %p737_p10, %p734_p9 }
 0x243   :  { %742 = shalt.err (!%p739_p11)
}
 0x244   :  { %424 = dma.vmem_to_hbm [thread:$0]  %s422_s27, 16, %s883_s4, [#allocation4]  }
 0x245   :  { %749 = dma.done.wait [#allocation4], 16  }
 0x246   :  { %750 = vsyncadd [#allocation4], 4294967280 }
 0x247   :  { %428 = vsyncpa [#allocation3], 1 }
 0x248   :  { %429 = vsyncpa [#allocation6], 1 }
 0x249   :  { %430 = vsyncpa [#allocation9], 1 }
 0x24a   :  { %431 = vsyncpa [#allocation4], 1 }

</bundles_post_ra>
